<compile_context>
chip_gen: v7x
topology: tpu7x:2x2x1
jax: 0.10.0
libtpu: 0.0.40
codegen_flags: <defaults>
</compile_context>

<pallas_src>
import functools

import jax
import jax.numpy as jnp
from jax.experimental import pallas as pl
from jax.experimental.pallas import tpu as pltpu


def _mlp_kernel(num_layers, x_ref, *refs):
    """Fused MLP forward on (features, batch) activations:
    h_{i+1} = relu(W_i @ h_i + b_i); no ReLU after the last layer (build_mlp del[-1])."""
    out_ref = refs[-1]
    params = refs[:-1]  # w0, b0, w1, b1, ...
    h = x_ref[...].astype(jnp.float32)                       # (in_0, tb), batch on lanes
    for i in range(num_layers):
        w = params[2 * i][...]                               # (out_i, in_i) bf16 -> MXU operand
        b = params[2 * i + 1][...].astype(jnp.float32)       # (out_i, 1), broadcasts over lanes
        h = jnp.dot(w, h.astype(jnp.bfloat16),
                    preferred_element_type=jnp.float32) + b  # bf16 MXU, f32 accumulate/epilogue
        if i < num_layers - 1:
            h = jnp.maximum(h, 0.0)
    out_ref[...] = h.astype(out_ref.dtype)


def _const_param_spec(shape, single_buffer):
    """Grid-invariant (weight/bias) block: whole array, constant index_map."""
    kwargs = {"pipeline_mode": pl.Buffered(1)} if single_buffer else {}
    return pl.BlockSpec(shape, lambda i: (0, 0), **kwargs)


def qnet_forward(state, weights, biases, *, tb=None, single_buffer_params=True):
    """QNet.forward: state (B, state_dim) -> Q-values (B, action_dim).

    weights[i]: (d_{i+1}, d_i) bf16 (nn.Linear layout, y = W @ x); biases[i]: (d_{i+1}, 1) f32.
    """
    B, state_dim = state.shape
    num_layers = len(weights)
    out_dim = weights[-1].shape[0]

    # Batch on the lane axis; biggest lane tile that covers B (capped), padded not truncated.
    if tb is None:
        tb = min(512, pl.cdiv(B, 128) * 128)
    bp = pl.cdiv(B, tb) * tb
    x = state.T                                              # (state_dim, B) layout plumbing
    if bp != B:
        x = jnp.pad(x, ((0, 0), (0, bp - B)))

    in_specs = [pl.BlockSpec((state_dim, tb), lambda i: (0, i))]
    flat_params = []
    for w, b in zip(weights, biases):
        in_specs.append(_const_param_spec(w.shape, single_buffer_params))
        in_specs.append(_const_param_spec(b.shape, single_buffer_params))
        flat_params.extend([w, b])

    out_t = pl.pallas_call(
        functools.partial(_mlp_kernel, num_layers),
        out_shape=jax.ShapeDtypeStruct((out_dim, bp), state.dtype),
        grid_spec=pltpu.PrefetchScalarGridSpec(
            num_scalar_prefetch=0,
            grid=(bp // tb,),
            in_specs=in_specs,
            out_specs=pl.BlockSpec((out_dim, tb), lambda i: (0, i)),
        ),
        compiler_params=pltpu.CompilerParams(
            # Batch tiles are independent -> shard across TensorCores when grid > 1.
            dimension_semantics=("parallel",),
        ),
    )(x, *flat_params)

    return out_t[:, :B].T                                    # back to (B, action_dim)


def init_qnet_params(key, state_dim, hidden_dims, action_dim):
    """Params shaped like build_mlp([state_dim, *hidden_dims, action_dim]).
    Weights (out, in) in bf16 (MXU operands); biases (out, 1) in f32 (VPU epilogue)."""
    dims = [state_dim, *hidden_dims, action_dim]
    weights, biases = [], []
    for i in range(len(dims) - 1):
        key, wk, bk = jax.random.split(key, 3)
        bound = 1.0 / float(dims[i]) ** 0.5                  # PyTorch nn.Linear default bound
        w = jax.random.uniform(wk, (dims[i + 1], dims[i]), jnp.float32, -bound, bound)
        b = jax.random.uniform(bk, (dims[i + 1], 1), jnp.float32, -bound, bound)
        weights.append(w.astype(jnp.bfloat16))
        biases.append(b)
    return weights, biases


def qnet_forward_ref(state, weights, biases):
    """Pure-JAX reference in the natural (batch, features) orientation, same bf16 casts."""
    h = state.astype(jnp.float32)
    for i, (w, b) in enumerate(zip(weights, biases)):
        h = jnp.dot(h.astype(jnp.bfloat16), w.T,
                    preferred_element_type=jnp.float32) + b.astype(jnp.float32).T
        if i < len(weights) - 1:
            h = jnp.maximum(h, 0.0)
    return h.astype(state.dtype)


if __name__ == "__main__":
    # QNet(dims=[32, 32], state_dim=8, action_dim=4); batch=200 exercises lane padding
    # (200 -> 256) with the auto tile, and an explicit tb=128 run exercises the 2-tile
    # parallel grid path.
    key = jax.random.PRNGKey(0)
    key, pkey, skey = jax.random.split(key, 3)

    state_dim, hidden_dims, action_dim, batch = 8, [32, 32], 4, 200
    weights, biases = init_qnet_params(pkey, state_dim, hidden_dims, action_dim)
    state = jax.random.normal(skey, (batch, state_dim), dtype=jnp.float32)

    def run(**kw):
        try:
            return jax.block_until_ready(qnet_forward(state, weights, biases, **kw))
        except Exception:
            # Fallback if this jax build rejects single-buffered (pl.Buffered(1)) param specs.
            return jax.block_until_ready(
                qnet_forward(state, weights, biases, single_buffer_params=False, **kw))

    q_ref = qnet_forward_ref(state, weights, biases)
    q_auto = run()            # auto tb=256: single grid step, padded batch
    q_tiled = run(tb=128)     # two lane-dense tiles, "parallel" grid axis
    for q in (q_auto, q_tiled):
        assert q.shape == (batch, action_dim)
        assert jnp.allclose(q, q_ref, atol=1e-3, rtol=1e-3), \
            float(jnp.max(jnp.abs(q - q_ref)))

    # TODO(synk): get_action's epsilon-greedy branch (torch.rand / torch.randint) is host-side
    # control flow around forward(); only forward() is implemented as a kernel.
    print("KERNEL_OK")
</pallas_src>

<mosaic_0001>
module attributes {stable_mosaic.version = 11 : i64} {
  func.func @_mlp_kernel(%arg0: i32, %arg1: memref<8x256xf32, #tpu.memory_space<vmem>>, %arg2: memref<32x8xbf16, #tpu.memory_space<vmem>>, %arg3: memref<32x1xf32, #tpu.memory_space<vmem>>, %arg4: memref<32x32xbf16, #tpu.memory_space<vmem>>, %arg5: memref<32x1xf32, #tpu.memory_space<vmem>>, %arg6: memref<4x32xbf16, #tpu.memory_space<vmem>>, %arg7: memref<4x1xf32, #tpu.memory_space<vmem>>, %arg8: memref<4x256xf32, #tpu.memory_space<vmem>>) attributes {dimension_semantics = [#tpu.dimension_semantics<parallel>], iteration_bounds = array<i64: 1>, scalar_prefetch = 0 : i64, scratch_operands = 0 : i64, tpu.core_type = #tpu.core_type<tc>, window_params = [{transform_indices = @transform_0, window_bounds = array<i64: 8, 256>}, {pipeline_mode = #tpu.pipeline_mode<synchronous>, transform_indices = @transform_1, window_bounds = array<i64: 32, 8>}, {pipeline_mode = #tpu.pipeline_mode<synchronous>, transform_indices = @transform_2, window_bounds = array<i64: 32, 1>}, {pipeline_mode = #tpu.pipeline_mode<synchronous>, transform_indices = @transform_3, window_bounds = array<i64: 32, 32>}, {pipeline_mode = #tpu.pipeline_mode<synchronous>, transform_indices = @transform_4, window_bounds = array<i64: 32, 1>}, {pipeline_mode = #tpu.pipeline_mode<synchronous>, transform_indices = @transform_5, window_bounds = array<i64: 4, 32>}, {pipeline_mode = #tpu.pipeline_mode<synchronous>, transform_indices = @transform_6, window_bounds = array<i64: 4, 1>}, {transform_indices = @transform_7, window_bounds = array<i64: 4, 256>}]} {
    %c0 = arith.constant 0 : index
    %c0_0 = arith.constant 0 : index
    %0 = vector.load %arg1[%c0, %c0_0] : memref<8x256xf32, #tpu.memory_space<vmem>>, vector<8x256xf32>
    %c0_1 = arith.constant 0 : index
    %c0_2 = arith.constant 0 : index
    %1 = vector.load %arg2[%c0_1, %c0_2] : memref<32x8xbf16, #tpu.memory_space<vmem>>, vector<32x8xbf16>
    %c0_3 = arith.constant 0 : index
    %c0_4 = arith.constant 0 : index
    %2 = vector.load %arg3[%c0_3, %c0_4] : memref<32x1xf32, #tpu.memory_space<vmem>>, vector<32x1xf32>
    %3 = arith.truncf %0 : vector<8x256xf32> to vector<8x256xbf16>
    %cst = arith.constant dense<0.000000e+00> : vector<32x256xf32>
    %4 = tpu.matmul %1, %3, %cst {dimension_numbers = #tpu.dot_dimension_numbers<[1], [0], [0], [1], [0, 0, 1, 1], [], []>} : vector<32x8xbf16>, vector<8x256xbf16>, vector<32x256xf32> -> vector<32x256xf32>
    %5 = vector.broadcast %2 : vector<32x1xf32> to vector<32x256xf32>
    %6 = arith.addf %4, %5 : vector<32x256xf32>
    %cst_5 = arith.constant 0.000000e+00 : f32
    %7 = vector.broadcast %cst_5 : f32 to vector<32x256xf32>
    %8 = arith.maximumf %6, %7 : vector<32x256xf32>
    %c0_6 = arith.constant 0 : index
    %c0_7 = arith.constant 0 : index
    %9 = vector.load %arg4[%c0_6, %c0_7] : memref<32x32xbf16, #tpu.memory_space<vmem>>, vector<32x32xbf16>
    %c0_8 = arith.constant 0 : index
    %c0_9 = arith.constant 0 : index
    %10 = vector.load %arg5[%c0_8, %c0_9] : memref<32x1xf32, #tpu.memory_space<vmem>>, vector<32x1xf32>
    %11 = arith.truncf %8 : vector<32x256xf32> to vector<32x256xbf16>
    %cst_10 = arith.constant dense<0.000000e+00> : vector<32x256xf32>
    %12 = tpu.matmul %9, %11, %cst_10 {dimension_numbers = #tpu.dot_dimension_numbers<[1], [0], [0], [1], [0, 0, 1, 1], [], []>} : vector<32x32xbf16>, vector<32x256xbf16>, vector<32x256xf32> -> vector<32x256xf32>
    %13 = vector.broadcast %10 : vector<32x1xf32> to vector<32x256xf32>
    %14 = arith.addf %12, %13 : vector<32x256xf32>
    %cst_11 = arith.constant 0.000000e+00 : f32
    %15 = vector.broadcast %cst_11 : f32 to vector<32x256xf32>
    %16 = arith.maximumf %14, %15 : vector<32x256xf32>
    %c0_12 = arith.constant 0 : index
    %c0_13 = arith.constant 0 : index
    %17 = vector.load %arg6[%c0_12, %c0_13] : memref<4x32xbf16, #tpu.memory_space<vmem>>, vector<4x32xbf16>
    %c0_14 = arith.constant 0 : index
    %c0_15 = arith.constant 0 : index
    %18 = vector.load %arg7[%c0_14, %c0_15] : memref<4x1xf32, #tpu.memory_space<vmem>>, vector<4x1xf32>
    %19 = arith.truncf %16 : vector<32x256xf32> to vector<32x256xbf16>
    %cst_16 = arith.constant dense<0.000000e+00> : vector<4x256xf32>
    %20 = tpu.matmul %17, %19, %cst_16 {dimension_numbers = #tpu.dot_dimension_numbers<[1], [0], [0], [1], [0, 0, 1, 1], [], []>} : vector<4x32xbf16>, vector<32x256xbf16>, vector<4x256xf32> -> vector<4x256xf32>
    %21 = vector.broadcast %18 : vector<4x1xf32> to vector<4x256xf32>
    %22 = arith.addf %20, %21 : vector<4x256xf32>
    %c0_17 = arith.constant 0 : index
    %c0_18 = arith.constant 0 : index
    %23 = vector.load %arg8[%c0_17, %c0_18] : memref<4x256xf32, #tpu.memory_space<vmem>>, vector<4x256xf32>
    tpu.vector_store %arg8[%c0_17, %c0_18], %22 {strides = array<i32>} : memref<4x256xf32, #tpu.memory_space<vmem>>, vector<4x256xf32>,
    return
  }
  func.func @transform_0(%arg0: i32) -> (i32, i32) {
    %c0_i32 = arith.constant 0 : i32
    %c0_i32_0 = arith.constant 0 : i32
    return %c0_i32, %arg0 : i32, i32
  }
  func.func @transform_1(%arg0: i32) -> (i32, i32) {
    %c0_i32 = arith.constant 0 : i32
    %c0_i32_0 = arith.constant 0 : i32
    %c0_i32_1 = arith.constant 0 : i32
    return %c0_i32, %c0_i32_0 : i32, i32
  }
  func.func @transform_2(%arg0: i32) -> (i32, i32) {
    %c0_i32 = arith.constant 0 : i32
    %c0_i32_0 = arith.constant 0 : i32
    %c0_i32_1 = arith.constant 0 : i32
    return %c0_i32, %c0_i32_0 : i32, i32
  }
  func.func @transform_3(%arg0: i32) -> (i32, i32) {
    %c0_i32 = arith.constant 0 : i32
    %c0_i32_0 = arith.constant 0 : i32
    %c0_i32_1 = arith.constant 0 : i32
    return %c0_i32, %c0_i32_0 : i32, i32
  }
  func.func @transform_4(%arg0: i32) -> (i32, i32) {
    %c0_i32 = arith.constant 0 : i32
    %c0_i32_0 = arith.constant 0 : i32
    %c0_i32_1 = arith.constant 0 : i32
    return %c0_i32, %c0_i32_0 : i32, i32
  }
  func.func @transform_5(%arg0: i32) -> (i32, i32) {
    %c0_i32 = arith.constant 0 : i32
    %c0_i32_0 = arith.constant 0 : i32
    %c0_i32_1 = arith.constant 0 : i32
    return %c0_i32, %c0_i32_0 : i32, i32
  }
  func.func @transform_6(%arg0: i32) -> (i32, i32) {
    %c0_i32 = arith.constant 0 : i32
    %c0_i32_0 = arith.constant 0 : i32
    %c0_i32_1 = arith.constant 0 : i32
    return %c0_i32, %c0_i32_0 : i32, i32
  }
  func.func @transform_7(%arg0: i32) -> (i32, i32) {
    %c0_i32 = arith.constant 0 : i32
    %c0_i32_0 = arith.constant 0 : i32
    return %c0_i32, %arg0 : i32, i32
  }
}

module attributes {stable_mosaic.version = 11 : i64} {
  func.func @_mlp_kernel(%arg0: i32, %arg1: memref<8x256xf32, #tpu.memory_space<vmem>>, %arg2: memref<32x8xbf16, #tpu.memory_space<vmem>>, %arg3: memref<32x1xf32, #tpu.memory_space<vmem>>, %arg4: memref<32x32xbf16, #tpu.memory_space<vmem>>, %arg5: memref<32x1xf32, #tpu.memory_space<vmem>>, %arg6: memref<4x32xbf16, #tpu.memory_space<vmem>>, %arg7: memref<4x1xf32, #tpu.memory_space<vmem>>, %arg8: memref<4x256xf32, #tpu.memory_space<vmem>>) attributes {dimension_semantics = [#tpu.dimension_semantics<parallel>], iteration_bounds = array<i64: 1>, scalar_prefetch = 0 : i64, scratch_operands = 0 : i64, tpu.core_type = #tpu.core_type<tc>, window_params = [{transform_indices = @transform_0, window_bounds = array<i64: 8, 256>}, {pipeline_mode = #tpu.pipeline_mode<synchronous>, transform_indices = @transform_1, window_bounds = array<i64: 32, 8>}, {pipeline_mode = #tpu.pipeline_mode<synchronous>, transform_indices = @transform_2, window_bounds = array<i64: 32, 1>}, {pipeline_mode = #tpu.pipeline_mode<synchronous>, transform_indices = @transform_3, window_bounds = array<i64: 32, 32>}, {pipeline_mode = #tpu.pipeline_mode<synchronous>, transform_indices = @transform_4, window_bounds = array<i64: 32, 1>}, {pipeline_mode = #tpu.pipeline_mode<synchronous>, transform_indices = @transform_5, window_bounds = array<i64: 4, 32>}, {pipeline_mode = #tpu.pipeline_mode<synchronous>, transform_indices = @transform_6, window_bounds = array<i64: 4, 1>}, {transform_indices = @transform_7, window_bounds = array<i64: 4, 256>}]} {
    %c0 = arith.constant 0 : index
    %c0_0 = arith.constant 0 : index
    %0 = vector.load %arg1[%c0, %c0_0] : memref<8x256xf32, #tpu.memory_space<vmem>>, vector<8x256xf32>
    %c0_1 = arith.constant 0 : index
    %c0_2 = arith.constant 0 : index
    %1 = vector.load %arg2[%c0_1, %c0_2] : memref<32x8xbf16, #tpu.memory_space<vmem>>, vector<32x8xbf16>
    %c0_3 = arith.constant 0 : index
    %c0_4 = arith.constant 0 : index
    %2 = vector.load %arg3[%c0_3, %c0_4] : memref<32x1xf32, #tpu.memory_space<vmem>>, vector<32x1xf32>
    %3 = arith.truncf %0 : vector<8x256xf32> to vector<8x256xbf16>
    %cst = arith.constant dense<0.000000e+00> : vector<32x256xf32>
    %4 = tpu.matmul %1, %3, %cst {dimension_numbers = #tpu.dot_dimension_numbers<[1], [0], [0], [1], [0, 0, 1, 1], [], []>} : vector<32x8xbf16>, vector<8x256xbf16>, vector<32x256xf32> -> vector<32x256xf32>
    %5 = vector.broadcast %2 : vector<32x1xf32> to vector<32x256xf32>
    %6 = arith.addf %4, %5 : vector<32x256xf32>
    %cst_5 = arith.constant 0.000000e+00 : f32
    %7 = vector.broadcast %cst_5 : f32 to vector<32x256xf32>
    %8 = arith.maximumf %6, %7 : vector<32x256xf32>
    %c0_6 = arith.constant 0 : index
    %c0_7 = arith.constant 0 : index
    %9 = vector.load %arg4[%c0_6, %c0_7] : memref<32x32xbf16, #tpu.memory_space<vmem>>, vector<32x32xbf16>
    %c0_8 = arith.constant 0 : index
    %c0_9 = arith.constant 0 : index
    %10 = vector.load %arg5[%c0_8, %c0_9] : memref<32x1xf32, #tpu.memory_space<vmem>>, vector<32x1xf32>
    %11 = arith.truncf %8 : vector<32x256xf32> to vector<32x256xbf16>
    %cst_10 = arith.constant dense<0.000000e+00> : vector<32x256xf32>
    %12 = tpu.matmul %9, %11, %cst_10 {dimension_numbers = #tpu.dot_dimension_numbers<[1], [0], [0], [1], [0, 0, 1, 1], [], []>} : vector<32x32xbf16>, vector<32x256xbf16>, vector<32x256xf32> -> vector<32x256xf32>
    %13 = vector.broadcast %10 : vector<32x1xf32> to vector<32x256xf32>
    %14 = arith.addf %12, %13 : vector<32x256xf32>
    %cst_11 = arith.constant 0.000000e+00 : f32
    %15 = vector.broadcast %cst_11 : f32 to vector<32x256xf32>
    %16 = arith.maximumf %14, %15 : vector<32x256xf32>
    %c0_12 = arith.constant 0 : index
    %c0_13 = arith.constant 0 : index
    %17 = vector.load %arg6[%c0_12, %c0_13] : memref<4x32xbf16, #tpu.memory_space<vmem>>, vector<4x32xbf16>
    %c0_14 = arith.constant 0 : index
    %c0_15 = arith.constant 0 : index
    %18 = vector.load %arg7[%c0_14, %c0_15] : memref<4x1xf32, #tpu.memory_space<vmem>>, vector<4x1xf32>
    %19 = arith.truncf %16 : vector<32x256xf32> to vector<32x256xbf16>
    %cst_16 = arith.constant dense<0.000000e+00> : vector<4x256xf32>
    %20 = tpu.matmul %17, %19, %cst_16 {dimension_numbers = #tpu.dot_dimension_numbers<[1], [0], [0], [1], [0, 0, 1, 1], [], []>} : vector<4x32xbf16>, vector<32x256xbf16>, vector<4x256xf32> -> vector<4x256xf32>
    %21 = vector.broadcast %18 : vector<4x1xf32> to vector<4x256xf32>
    %22 = arith.addf %20, %21 : vector<4x256xf32>
    %c0_17 = arith.constant 0 : index
    %c0_18 = arith.constant 0 : index
    %23 = vector.load %arg8[%c0_17, %c0_18] : memref<4x256xf32, #tpu.memory_space<vmem>>, vector<4x256xf32>
    tpu.vector_store %arg8[%c0_17, %c0_18], %22 {strides = array<i32>} : memref<4x256xf32, #tpu.memory_space<vmem>>, vector<4x256xf32>,
    return
  }
  func.func @transform_0(%arg0: i32) -> (i32, i32) {
    %c0_i32 = arith.constant 0 : i32
    %c0_i32_0 = arith.constant 0 : i32
    return %c0_i32, %arg0 : i32, i32
  }
  func.func @transform_1(%arg0: i32) -> (i32, i32) {
    %c0_i32 = arith.constant 0 : i32
    %c0_i32_0 = arith.constant 0 : i32
    %c0_i32_1 = arith.constant 0 : i32
    return %c0_i32, %c0_i32_0 : i32, i32
  }
  func.func @transform_2(%arg0: i32) -> (i32, i32) {
    %c0_i32 = arith.constant 0 : i32
    %c0_i32_0 = arith.constant 0 : i32
    %c0_i32_1 = arith.constant 0 : i32
    return %c0_i32, %c0_i32_0 : i32, i32
  }
  func.func @transform_3(%arg0: i32) -> (i32, i32) {
    %c0_i32 = arith.constant 0 : i32
    %c0_i32_0 = arith.constant 0 : i32
    %c0_i32_1 = arith.constant 0 : i32
    return %c0_i32, %c0_i32_0 : i32, i32
  }
  func.func @transform_4(%arg0: i32) -> (i32, i32) {
    %c0_i32 = arith.constant 0 : i32
    %c0_i32_0 = arith.constant 0 : i32
    %c0_i32_1 = arith.constant 0 : i32
    return %c0_i32, %c0_i32_0 : i32, i32
  }
  func.func @transform_5(%arg0: i32) -> (i32, i32) {
    %c0_i32 = arith.constant 0 : i32
    %c0_i32_0 = arith.constant 0 : i32
    %c0_i32_1 = arith.constant 0 : i32
    return %c0_i32, %c0_i32_0 : i32, i32
  }
  func.func @transform_6(%arg0: i32) -> (i32, i32) {
    %c0_i32 = arith.constant 0 : i32
    %c0_i32_0 = arith.constant 0 : i32
    %c0_i32_1 = arith.constant 0 : i32
    return %c0_i32, %c0_i32_0 : i32, i32
  }
  func.func @transform_7(%arg0: i32) -> (i32, i32) {
    %c0_i32 = arith.constant 0 : i32
    %c0_i32_0 = arith.constant 0 : i32
    return %c0_i32, %arg0 : i32, i32
  }
}

</mosaic_0001>

<bundles_post_ra>
// kernel: tpu_custom_call.1
= control target key start
LH: loop header
LB: loop body
LE: loop exit
PB: predicated region body
PF: predicated region fallthrough
CT: control target
= control target key end

     0   :  { %vm77_vm0 = vcmask 1043456   ;;  %v371_v4 = vmov 0   ;;  %vm70_vm1 = vcmask 64512   ;;  %s485_s0 = inlined_call_operand.vmem [shape: f32[8,256], index: 0, kind: input, shape index: {}]   ;;  %s486_s1 = inlined_call_operand.vmem [shape: bf16[32,8], index: 1, kind: input, shape index: {}]   ;;  %s487_s2 = inlined_call_operand.vmem [shape: f32[32,1], index: 2, kind: input, shape index: {}]   ;;  %s488_s3 = inlined_call_operand.vmem [shape: bf16[32,32], index: 3, kind: input, shape index: {}]   ;;  %s489_s4 = inlined_call_operand.vmem [shape: f32[32,1], index: 4, kind: input, shape index: {}]   ;;  %s490_s5 = inlined_call_operand.vmem [shape: bf16[4,32], index: 5, kind: input, shape index: {}]   ;;  %s491_s6 = inlined_call_operand.vmem [shape: f32[4,1], index: 6, kind: input, shape index: {}]   ;;  %s492_s7 = inlined_call_operand.hbm [shape: f32[4,256], index: 7, kind: output, shape index: {}]  }
   0x1   :  { %v29_v0 = vld [vmem:[%s485_s0 + $0x8] sm:$0xff]  ;;  %v28_v1 = vld [vmem:[%s485_s0] sm:$0xff]  ;;  %116 = vmatprep.mubr.bf16.mxu0 %v371_v4  ;;  %341 = vset.pattern.permute.xlu0 %v371_v4  ;;  %v36_v8 = vld [vmem:[%s487_s2 + $0x10] sm:$0xff] }
   0x2   :  { %v39_v2 = vpack.c.bf16 %v29_v0, %v29_v0  ;;  %v38_v3 = vpack.c.bf16 %v28_v1, %v28_v1  ;;  %v34_v5 = vld [vmem:[%s487_s2] sm:$0xff]  ;;  %342 = vset.pattern.permute.xlu1 %v371_v4  ;;  %226 = vmatprep.mubr.bf16.mxu1 %v371_v4  ;;  %v35_v9 = vld [vmem:[%s487_s2 + $0x8] sm:$0xff]  ;;  %v37_v10 = vld [vmem:[%s487_s2 + $0x18] sm:$0xff] }
   0x3   :  { %v343_v7 = vld [vmem:[%s486_s1] sm:$0xff]   ;;  %42 = vperm.xlu0 %341, %v34_v5   ;;  %52 = vperm.xlu1 %342, %v36_v8  }
   0x4   :  { %331 = vmatprep.subr.msk.bf16.mxu0 %vm77_vm0, %v39_v2  ;;  %v79_v6 = vsel %vm77_vm0, %v38_v3, 0 }
   0x5   :  { %85 = vmatpush1.bf16.msra.mxu0 %v79_v6 }
   0x7   :  { %47 = vperm.xlu0 %341, %v35_v9  }
   0x8   :  { %332 = vmatmul.mubr.msk.bf16.vlgmr.msra.gmra.mrb[0].mxu0 %vm70_vm1, %v343_v7 }
   0x9   :  { %12 = vsyncpa [#allocation3], 0  ;;  %126 = vmatprep.mubr.bf16.mxu0 %v371_v4  ;;  %v149_v11 = vld [vmem:[%s489_s4] sm:$0xff]  ;;  %57 = vperm.xlu1 %342, %v37_v10   ;;  %v150_v12 = vld [vmem:[%s489_s4 + $0x8] sm:$0xff]  ;;  %vm187_vm2 = vcmask 261120   ;;  %s372_s27 = smov [#allocation2]  }
   0xa   :  { %v344_v13 = vld [vmem:[%s486_s1 + $0x8] sm:$0xff]   ;;  %v151_v14 = vld [vmem:[%s489_s4 + $0x10] sm:$0xff]  ;;  %v152_v15 = vld [vmem:[%s489_s4 + $0x18] sm:$0xff]  ;;  %s321_s28 = sshll.u32 %s372_s27, 4  ;;  %s322_s28 = int_to_ptr.vmem [resolvable:$true] %s321_s28 }
   0xb   :  { %159 = vperm.xlu0 %341, %v149_v11   ;;  %v256_v16 = vld [vmem:[%s491_s6] sm:$0xf]  ;;  %v346_v50 = vld [vmem:[%s488_s3 + $0x8] sm:$0xff]   ;;  %s347_s29 = scalar_lea.vmem %s322_s28, 128  ;;  %p352_p1 = scmp.lt.s32.totalorder %s322_s28, %s322_s28 }
   0xc   :  { %v345_v49 = vld [vmem:[%s488_s3] sm:$0xff]   ;;  %p348_p0 = scmp.ne.s32.totalorder %s322_s28, %s347_s29  ;;  %p353_p2 = scmp.lt.s32.totalorder %s347_s29, %s347_s29 }
   0xd   :  { %164 = vperm.xlu1 %342, %v150_v12  }
   0xe   :  { %p354_p3 = por %p353_p2, %p352_p1 }
   0xf   :  { %169 = vperm.xlu0 %341, %v151_v14  }
  0x10   :  { %333 = vmatmul.mubr.msk.bf16.gmra.mrb[4].mxu0 %vm70_vm1, %v344_v13  ;;  %p355_p4 = pnand %p354_p3, %p348_p0 }
  0x11   :  { %174 = vperm.xlu1 %342, %v152_v15   ;;  %301 = vmatprep.mubr.bf16.mxu0 %v371_v4 }
  0x13   :  { %263 = vperm.xlu0 %341, %v256_v16  }
  0x82   :  { %v43_v17 = vpop.permute.xlu0 %42  ;;  %v53_v26 = vpop.permute.xlu1 %52 }
  0x86   :  { %v48_v21 = vpop.permute.xlu0 %47 }
  0x88   :  { %v58_v37 = vpop.permute.xlu1 %57 }
  0x8a   :  { %v160_v51 = vpop.permute.xlu0 %159 }
  0x8c   :  { %v165_v55 = vpop.permute.xlu1 %164 }
  0x8e   :  { %v170_v2 = vpop.permute.xlu0 %169 }
  0x90   :  { %v175_v7 = vpop.permute.xlu1 %174 }
  0xdb   :  { %v118_v18 = vpop.f32.mrb[0].mxu0 }
  0xdc   :  { %v119_v19 = vadd.f32 %v118_v18, %v43_v17  ;;  %v120_v20 = vpop.f32.mrb[1].mxu0 }
  0xdd   :  { %v121_v22 = vadd.f32 %v120_v20, %v43_v17  ;;  %v122_v23 = vpop.f32.mrb[2].mxu0  ;;  %v264_v20 = vpop.permute.xlu0 %263 }
  0xde   :  { %v123_v24 = vadd.f32 %v122_v23, %v48_v21  ;;  %v124_v25 = vpop.f32.mrb[3].mxu0  ;;  %v137_v28 = vmax.f32 %v119_v19, 0.0  ;;  %v255_v19 = vld [vmem:[%s490_s5] sm:$0x3] }
  0xdf   :  { %v125_v27 = vadd.f32 %v124_v25, %v48_v21  ;;  %v138_v30 = vmax.f32 %v121_v22, 0.0 }
  0xe0   :  { %v139_v29 = vmax.f32 %v123_v24, 0.0 }
  0xe1   :  { %v140_v31 = vmax.f32 %v125_v27, 0.0 }
  0xe2   :  { %v153_v32 = vpack.c.bf16 %v139_v29, %v137_v28 }
  0xe3   :  { %v128_v33 = vpop.f32.mrb[4].mxu0  ;;  %v154_v34 = vpack.c.bf16 %v140_v31, %v138_v30 }
  0xe4   :  { %v129_v35 = vadd.f32 %v128_v33, %v53_v26  ;;  %v130_v36 = vpop.f32.mrb[5].mxu0 }
  0xe5   :  { %v131_v38 = vadd.f32 %v130_v36, %v53_v26  ;;  %v132_v39 = vpop.f32.mrb[6].mxu0  ;;  %194 = vmatprep.subr.bf16.mxu1 %v154_v34 }
  0xe6   :  { %v133_v40 = vadd.f32 %v132_v39, %v58_v37  ;;  %v134_v41 = vpop.f32.mrb[7].mxu0  ;;  %195 = vmatpush1.bf16.msra.mxu1 %v153_v32  ;;  %v141_v43 = vmax.f32 %v129_v35, 0.0 }
  0xe7   :  { %v135_v42 = vadd.f32 %v134_v41, %v58_v37  ;;  %v142_v45 = vmax.f32 %v131_v38, 0.0 }
  0xe8   :  { %v143_v44 = vmax.f32 %v133_v40, 0.0 }
  0xe9   :  { %v144_v46 = vmax.f32 %v135_v42, 0.0 }
  0xea   :  { %v155_v47 = vpack.c.bf16 %v143_v44, %v141_v43 }
  0xeb   :  { %v156_v48 = vpack.c.bf16 %v144_v46, %v142_v45 }
  0xed   :  { %196 = vmatprep.subr.bf16.mxu1 %v156_v48 }
  0xee   :  { %197 = vmatpush1.bf16.msra.mxu1 %v155_v47 }
  0xf1   :  { %336 = vmatmul.mubr.msk.bf16.vlgmr.msra.gmra.mrb[0].mxu1 %vm187_vm2, %v345_v49 }
  0xf2   :  { %236 = vmatprep.mubr.bf16.mxu1 %v371_v4 }
  0xf9   :  { %337 = vmatmul.mubr.msk.bf16.gmra.mrb[4].mxu1 %vm187_vm2, %v346_v50 }
 0x1c4   :  { %v228_v52 = vpop.f32.mrb[0].mxu1 }
 0x1c5   :  { %v229_v53 = vadd.f32 %v228_v52, %v160_v51  ;;  %v230_v54 = vpop.f32.mrb[1].mxu1 }
 0x1c6   :  { %v231_v56 = vadd.f32 %v230_v54, %v160_v51  ;;  %v232_v57 = vpop.f32.mrb[2].mxu1 }
 0x1c7   :  { %v233_v58 = vadd.f32 %v232_v57, %v165_v55  ;;  %v234_v59 = vpop.f32.mrb[3].mxu1  ;;  %v247_v61 = vmax.f32 %v229_v53, 0.0 }
 0x1c8   :  { %v235_v60 = vadd.f32 %v234_v59, %v165_v55  ;;  %v248_v63 = vmax.f32 %v231_v56, 0.0 }
 0x1c9   :  { %v249_v62 = vmax.f32 %v233_v58, 0.0 }
 0x1ca   :  { %v250_v0 = vmax.f32 %v235_v60, 0.0 }
 0x1cb   :  { %v257_v1 = vpack.c.bf16 %v249_v62, %v247_v61 }
 0x1cc   :  { %v258_v3 = vpack.c.bf16 %v250_v0, %v248_v63  ;;  %v238_v4 = vpop.f32.mrb[4].mxu1 }
 0x1cd   :  { %v239_v5 = vadd.f32 %v238_v4, %v170_v2  ;;  %v240_v6 = vpop.f32.mrb[5].mxu1 }
 0x1ce   :  { %v241_v8 = vadd.f32 %v240_v6, %v170_v2  ;;  %v242_v9 = vpop.f32.mrb[6].mxu1  ;;  %269 = vmatprep.subr.bf16.mxu0 %v258_v3 }
 0x1cf   :  { %v243_v10 = vadd.f32 %v242_v9, %v175_v7  ;;  %v244_v11 = vpop.f32.mrb[7].mxu1  ;;  %270 = vmatpush1.bf16.msra.mxu0 %v257_v1  ;;  %v251_v13 = vmax.f32 %v239_v5, 0.0 }
 0x1d0   :  { %v245_v12 = vadd.f32 %v244_v11, %v175_v7  ;;  %v252_v15 = vmax.f32 %v241_v8, 0.0 }
 0x1d1   :  { %v253_v14 = vmax.f32 %v243_v10, 0.0 }
 0x1d2   :  { %v254_v16 = vmax.f32 %v245_v12, 0.0 }
 0x1d3   :  { %v259_v17 = vpack.c.bf16 %v253_v14, %v251_v13 }
 0x1d4   :  { %v260_v18 = vpack.c.bf16 %v254_v16, %v252_v15 }
 0x1d6   :  { %271 = vmatprep.subr.bf16.mxu0 %v260_v18 }
 0x1d7   :  { %272 = vmatpush1.bf16.msra.mxu0 %v259_v17 }
 0x1da   :  { %338 = vmatmul.mubr.msk.bf16.vlgmr.msra.gmra.mrb[8].mxu0 %vm187_vm2, %v255_v19 }
 0x2ad   :  { %v303_v21 = vpop.f32.mrb[8].mxu0 }
 0x2ae   :  { %v304_v22 = vadd.f32 %v303_v21, %v264_v20  ;;  %v305_v23 = vpop.f32.mrb[9].mxu0 }
 0x2af   :  { %v306_v24 = vadd.f32 %v305_v23, %v264_v20  ;;  %v307_v25 = vpop.f32.mrb[10].mxu0 }
 0x2b0   :  { %v308_v26 = vpop.f32.mrb[11].mxu0 }
 0x2b1   :  { %v312_v27 = vcombine.low %v304_v22, %v306_v24 }
 0x2b3   :  { %314 = vst [vmem:[#allocation2] sm:$0xff] %v312_v27 }
 0x2b4   :  { %358 = shalt.err (!%p355_p4)
}
 0x2b5   :  { %s359_s8 = scalar_lea.hbm %s492_s7, 128 }
 0x2b6   :  { %p360_p5 = scmp.ne.s32.totalorder %s492_s7, %s359_s8  ;;  %p363_p6 = scmp.lt.u32.totalorder %s359_s8, %s492_s7 }
 0x2b8   :  { %p365_p7 = pnand %p363_p6, %p360_p5 }
 0x2ba   :  { %368 = shalt.err (!%p365_p7)
}
 0x2bb   :  { %324 = dma.vmem_to_hbm [thread:$0]  %s322_s28, 128, %s492_s7, [#allocation3]  }
 0x2bc   :  { %369 = dma.done.wait [#allocation3], 128  }
 0x2bd   :  { %370 = vsyncadd [#allocation3], 4294967168 }
 0x2be   :  { %328 = vsyncpa [#allocation3], 1 }

// kernel: tpu_custom_call.1
= control target key start
LH: loop header
LB: loop body
LE: loop exit
PB: predicated region body
PF: predicated region fallthrough
CT: control target
= control target key end

     0   :  { %vm77_vm0 = vcmask 1043456   ;;  %v371_v4 = vmov 0   ;;  %vm70_vm1 = vcmask 64512   ;;  %s485_s0 = inlined_call_operand.vmem [shape: f32[8,256], index: 0, kind: input, shape index: {}]   ;;  %s486_s1 = inlined_call_operand.vmem [shape: bf16[32,8], index: 1, kind: input, shape index: {}]   ;;  %s487_s2 = inlined_call_operand.vmem [shape: f32[32,1], index: 2, kind: input, shape index: {}]   ;;  %s488_s3 = inlined_call_operand.vmem [shape: bf16[32,32], index: 3, kind: input, shape index: {}]   ;;  %s489_s4 = inlined_call_operand.vmem [shape: f32[32,1], index: 4, kind: input, shape index: {}]   ;;  %s490_s5 = inlined_call_operand.vmem [shape: bf16[4,32], index: 5, kind: input, shape index: {}]   ;;  %s491_s6 = inlined_call_operand.vmem [shape: f32[4,1], index: 6, kind: input, shape index: {}]   ;;  %s492_s7 = inlined_call_operand.hbm [shape: f32[4,256], index: 7, kind: output, shape index: {}]  }
   0x1   :  { %v29_v0 = vld [vmem:[%s485_s0 + $0x8] sm:$0xff]  ;;  %v28_v1 = vld [vmem:[%s485_s0] sm:$0xff]  ;;  %116 = vmatprep.mubr.bf16.mxu0 %v371_v4  ;;  %341 = vset.pattern.permute.xlu0 %v371_v4  ;;  %v36_v8 = vld [vmem:[%s487_s2 + $0x10] sm:$0xff] }
   0x2   :  { %v39_v2 = vpack.c.bf16 %v29_v0, %v29_v0  ;;  %v38_v3 = vpack.c.bf16 %v28_v1, %v28_v1  ;;  %v34_v5 = vld [vmem:[%s487_s2] sm:$0xff]  ;;  %342 = vset.pattern.permute.xlu1 %v371_v4  ;;  %226 = vmatprep.mubr.bf16.mxu1 %v371_v4  ;;  %v35_v9 = vld [vmem:[%s487_s2 + $0x8] sm:$0xff]  ;;  %v37_v10 = vld [vmem:[%s487_s2 + $0x18] sm:$0xff] }
   0x3   :  { %v343_v7 = vld [vmem:[%s486_s1] sm:$0xff]   ;;  %42 = vperm.xlu0 %341, %v34_v5   ;;  %52 = vperm.xlu1 %342, %v36_v8  }
   0x4   :  { %331 = vmatprep.subr.msk.bf16.mxu0 %vm77_vm0, %v39_v2  ;;  %v79_v6 = vsel %vm77_vm0, %v38_v3, 0 }
   0x5   :  { %85 = vmatpush1.bf16.msra.mxu0 %v79_v6 }
   0x7   :  { %47 = vperm.xlu0 %341, %v35_v9  }
   0x8   :  { %332 = vmatmul.mubr.msk.bf16.vlgmr.msra.gmra.mrb[0].mxu0 %vm70_vm1, %v343_v7 }
   0x9   :  { %12 = vsyncpa [#allocation3], 0  ;;  %126 = vmatprep.mubr.bf16.mxu0 %v371_v4  ;;  %v149_v11 = vld [vmem:[%s489_s4] sm:$0xff]  ;;  %57 = vperm.xlu1 %342, %v37_v10   ;;  %v150_v12 = vld [vmem:[%s489_s4 + $0x8] sm:$0xff]  ;;  %vm187_vm2 = vcmask 261120   ;;  %s372_s27 = smov [#allocation2]  }
   0xa   :  { %v344_v13 = vld [vmem:[%s486_s1 + $0x8] sm:$0xff]   ;;  %v151_v14 = vld [vmem:[%s489_s4 + $0x10] sm:$0xff]  ;;  %v152_v15 = vld [vmem:[%s489_s4 + $0x18] sm:$0xff]  ;;  %s321_s28 = sshll.u32 %s372_s27, 4  ;;  %s322_s28 = int_to_ptr.vmem [resolvable:$true] %s321_s28 }
   0xb   :  { %159 = vperm.xlu0 %341, %v149_v11   ;;  %v256_v16 = vld [vmem:[%s491_s6] sm:$0xf]  ;;  %v346_v50 = vld [vmem:[%s488_s3 + $0x8] sm:$0xff]   ;;  %s347_s29 = scalar_lea.vmem %s322_s28, 128  ;;  %p352_p1 = scmp.lt.s32.totalorder %s322_s28, %s322_s28 }
   0xc   :  { %v345_v49 = vld [vmem:[%s488_s3] sm:$0xff]   ;;  %p348_p0 = scmp.ne.s32.totalorder %s322_s28, %s347_s29  ;;  %p353_p2 = scmp.lt.s32.totalorder %s347_s29, %s347_s29 }
   0xd   :  { %164 = vperm.xlu1 %342, %v150_v12  }
   0xe   :  { %p354_p3 = por %p353_p2, %p352_p1 }
   0xf   :  { %169 = vperm.xlu0 %341, %v151_v14  }
  0x10   :  { %333 = vmatmul.mubr.msk.bf16.gmra.mrb[4].mxu0 %vm70_vm1, %v344_v13  ;;  %p355_p4 = pnand %p354_p3, %p348_p0 }
  0x11   :  { %174 = vperm.xlu1 %342, %v152_v15   ;;  %301 = vmatprep.mubr.bf16.mxu0 %v371_v4 }
  0x13   :  { %263 = vperm.xlu0 %341, %v256_v16  }
  0x82   :  { %v43_v17 = vpop.permute.xlu0 %42  ;;  %v53_v26 = vpop.permute.xlu1 %52 }
  0x86   :  { %v48_v21 = vpop.permute.xlu0 %47 }
  0x88   :  { %v58_v37 = vpop.permute.xlu1 %57 }
  0x8a   :  { %v160_v51 = vpop.permute.xlu0 %159 }
  0x8c   :  { %v165_v55 = vpop.permute.xlu1 %164 }
  0x8e   :  { %v170_v2 = vpop.permute.xlu0 %169 }
  0x90   :  { %v175_v7 = vpop.permute.xlu1 %174 }
  0xdb   :  { %v118_v18 = vpop.f32.mrb[0].mxu0 }
  0xdc   :  { %v119_v19 = vadd.f32 %v118_v18, %v43_v17  ;;  %v120_v20 = vpop.f32.mrb[1].mxu0 }
  0xdd   :  { %v121_v22 = vadd.f32 %v120_v20, %v43_v17  ;;  %v122_v23 = vpop.f32.mrb[2].mxu0  ;;  %v264_v20 = vpop.permute.xlu0 %263 }
  0xde   :  { %v123_v24 = vadd.f32 %v122_v23, %v48_v21  ;;  %v124_v25 = vpop.f32.mrb[3].mxu0  ;;  %v137_v28 = vmax.f32 %v119_v19, 0.0  ;;  %v255_v19 = vld [vmem:[%s490_s5] sm:$0x3] }
  0xdf   :  { %v125_v27 = vadd.f32 %v124_v25, %v48_v21  ;;  %v138_v30 = vmax.f32 %v121_v22, 0.0 }
  0xe0   :  { %v139_v29 = vmax.f32 %v123_v24, 0.0 }
  0xe1   :  { %v140_v31 = vmax.f32 %v125_v27, 0.0 }
  0xe2   :  { %v153_v32 = vpack.c.bf16 %v139_v29, %v137_v28 }
  0xe3   :  { %v128_v33 = vpop.f32.mrb[4].mxu0  ;;  %v154_v34 = vpack.c.bf16 %v140_v31, %v138_v30 }
  0xe4   :  { %v129_v35 = vadd.f32 %v128_v33, %v53_v26  ;;  %v130_v36 = vpop.f32.mrb[5].mxu0 }
  0xe5   :  { %v131_v38 = vadd.f32 %v130_v36, %v53_v26  ;;  %v132_v39 = vpop.f32.mrb[6].mxu0  ;;  %194 = vmatprep.subr.bf16.mxu1 %v154_v34 }
  0xe6   :  { %v133_v40 = vadd.f32 %v132_v39, %v58_v37  ;;  %v134_v41 = vpop.f32.mrb[7].mxu0  ;;  %195 = vmatpush1.bf16.msra.mxu1 %v153_v32  ;;  %v141_v43 = vmax.f32 %v129_v35, 0.0 }
  0xe7   :  { %v135_v42 = vadd.f32 %v134_v41, %v58_v37  ;;  %v142_v45 = vmax.f32 %v131_v38, 0.0 }
  0xe8   :  { %v143_v44 = vmax.f32 %v133_v40, 0.0 }
  0xe9   :  { %v144_v46 = vmax.f32 %v135_v42, 0.0 }
  0xea   :  { %v155_v47 = vpack.c.bf16 %v143_v44, %v141_v43 }
  0xeb   :  { %v156_v48 = vpack.c.bf16 %v144_v46, %v142_v45 }
  0xed   :  { %196 = vmatprep.subr.bf16.mxu1 %v156_v48 }
  0xee   :  { %197 = vmatpush1.bf16.msra.mxu1 %v155_v47 }
  0xf1   :  { %336 = vmatmul.mubr.msk.bf16.vlgmr.msra.gmra.mrb[0].mxu1 %vm187_vm2, %v345_v49 }
  0xf2   :  { %236 = vmatprep.mubr.bf16.mxu1 %v371_v4 }
  0xf9   :  { %337 = vmatmul.mubr.msk.bf16.gmra.mrb[4].mxu1 %vm187_vm2, %v346_v50 }
 0x1c4   :  { %v228_v52 = vpop.f32.mrb[0].mxu1 }
 0x1c5   :  { %v229_v53 = vadd.f32 %v228_v52, %v160_v51  ;;  %v230_v54 = vpop.f32.mrb[1].mxu1 }
 0x1c6   :  { %v231_v56 = vadd.f32 %v230_v54, %v160_v51  ;;  %v232_v57 = vpop.f32.mrb[2].mxu1 }
 0x1c7   :  { %v233_v58 = vadd.f32 %v232_v57, %v165_v55  ;;  %v234_v59 = vpop.f32.mrb[3].mxu1  ;;  %v247_v61 = vmax.f32 %v229_v53, 0.0 }
 0x1c8   :  { %v235_v60 = vadd.f32 %v234_v59, %v165_v55  ;;  %v248_v63 = vmax.f32 %v231_v56, 0.0 }
 0x1c9   :  { %v249_v62 = vmax.f32 %v233_v58, 0.0 }
 0x1ca   :  { %v250_v0 = vmax.f32 %v235_v60, 0.0 }
 0x1cb   :  { %v257_v1 = vpack.c.bf16 %v249_v62, %v247_v61 }
 0x1cc   :  { %v258_v3 = vpack.c.bf16 %v250_v0, %v248_v63  ;;  %v238_v4 = vpop.f32.mrb[4].mxu1 }
 0x1cd   :  { %v239_v5 = vadd.f32 %v238_v4, %v170_v2  ;;  %v240_v6 = vpop.f32.mrb[5].mxu1 }
 0x1ce   :  { %v241_v8 = vadd.f32 %v240_v6, %v170_v2  ;;  %v242_v9 = vpop.f32.mrb[6].mxu1  ;;  %269 = vmatprep.subr.bf16.mxu0 %v258_v3 }
 0x1cf   :  { %v243_v10 = vadd.f32 %v242_v9, %v175_v7  ;;  %v244_v11 = vpop.f32.mrb[7].mxu1  ;;  %270 = vmatpush1.bf16.msra.mxu0 %v257_v1  ;;  %v251_v13 = vmax.f32 %v239_v5, 0.0 }
 0x1d0   :  { %v245_v12 = vadd.f32 %v244_v11, %v175_v7  ;;  %v252_v15 = vmax.f32 %v241_v8, 0.0 }
 0x1d1   :  { %v253_v14 = vmax.f32 %v243_v10, 0.0 }
 0x1d2   :  { %v254_v16 = vmax.f32 %v245_v12, 0.0 }
 0x1d3   :  { %v259_v17 = vpack.c.bf16 %v253_v14, %v251_v13 }
 0x1d4   :  { %v260_v18 = vpack.c.bf16 %v254_v16, %v252_v15 }
 0x1d6   :  { %271 = vmatprep.subr.bf16.mxu0 %v260_v18 }
 0x1d7   :  { %272 = vmatpush1.bf16.msra.mxu0 %v259_v17 }
 0x1da   :  { %338 = vmatmul.mubr.msk.bf16.vlgmr.msra.gmra.mrb[8].mxu0 %vm187_vm2, %v255_v19 }
 0x2ad   :  { %v303_v21 = vpop.f32.mrb[8].mxu0 }
 0x2ae   :  { %v304_v22 = vadd.f32 %v303_v21, %v264_v20  ;;  %v305_v23 = vpop.f32.mrb[9].mxu0 }
 0x2af   :  { %v306_v24 = vadd.f32 %v305_v23, %v264_v20  ;;  %v307_v25 = vpop.f32.mrb[10].mxu0 }
 0x2b0   :  { %v308_v26 = vpop.f32.mrb[11].mxu0 }
 0x2b1   :  { %v312_v27 = vcombine.low %v304_v22, %v306_v24 }
 0x2b3   :  { %314 = vst [vmem:[#allocation2] sm:$0xff] %v312_v27 }
 0x2b4   :  { %358 = shalt.err (!%p355_p4)
}
 0x2b5   :  { %s359_s8 = scalar_lea.hbm %s492_s7, 128 }
 0x2b6   :  { %p360_p5 = scmp.ne.s32.totalorder %s492_s7, %s359_s8  ;;  %p363_p6 = scmp.lt.u32.totalorder %s359_s8, %s492_s7 }
 0x2b8   :  { %p365_p7 = pnand %p363_p6, %p360_p5 }
 0x2ba   :  { %368 = shalt.err (!%p365_p7)
}
 0x2bb   :  { %324 = dma.vmem_to_hbm [thread:$0]  %s322_s28, 128, %s492_s7, [#allocation3]  }
 0x2bc   :  { %369 = dma.done.wait [#allocation3], 128  }
 0x2bd   :  { %370 = vsyncadd [#allocation3], 4294967168 }
 0x2be   :  { %328 = vsyncpa [#allocation3], 1 }

</bundles_post_ra>
